<compile_context>
chip_gen: v6e
topology: v6e:2x2x1
jax: 0.10.0
libtpu: 0.0.40
codegen_flags: <defaults>
</compile_context>

<pallas_src>
import functools

import jax
import jax.numpy as jnp
from jax.experimental import pallas as pl
from jax.experimental.pallas import tpu as pltpu


# ----------------------------------------------------------------------------
# Kernel: processes one batch block of shape (block_n, S, H).
# ----------------------------------------------------------------------------
def attention_kernel(x_ref, w1_ref, b1_ref, w2_ref, b2_ref, out_ref, wts_ref,
                     *, compute_dtype):
    bn, S, H = x_ref.shape
    Hh = w1_ref.shape[1]

    # ---- Linear(H -> H/2) + ReLU: one MXU matmul per block ----
    # MXU operands in compute_dtype (bf16 default); f32 accumulation & vector math.
    x2 = x_ref[...].reshape(bn * S, H).astype(compute_dtype)
    w1 = w1_ref[...].astype(compute_dtype)
    h = jnp.dot(x2, w1, preferred_element_type=jnp.float32) + b1_ref[...]
    h = jnp.maximum(h, 0.0).reshape(bn, S, Hh)                    # (bn, S, Hh) f32

    # ---- Linear(H/2 -> 1): out_features == 1 -> lane reduction, not a matmul ----
    energy = jnp.sum(h * w2_ref[...], axis=-1) + b2_ref[...]      # (bn, S)

    # ---- softmax over the sentence axis (dim=1) — exact math ----
    m = jnp.max(energy, axis=1, keepdims=True)
    p = jnp.exp(energy - m)
    w = p / jnp.sum(p, axis=1, keepdims=True)                     # (bn, S)
    wts_ref[...] = w

    # ---- weighted sum over sentences: unrolled per-sentence VPU FMAs ----
    acc = x_ref[:, 0, :] * w[:, 0:1]
    for s in range(1, S):
        acc = acc + x_ref[:, s, :] * w[:, s:s + 1]
    out_ref[...] = acc                                            # (bn, H)


# ----------------------------------------------------------------------------
# Block-size heuristic: ~512 KiB of x per grid step, multiple of 8 rows,
# capped so the batch grid keeps >= 2 steps (v7x megacore) and VMEM
# double-buffering stays comfortable on v7x's 64 MiB.
# ----------------------------------------------------------------------------
def _pick_block_n(n, s, h, *, target_bytes=1 << 19, max_block_n=1024):
    row_bytes = s * h * 4
    bn = max(8, min(max_block_n, target_bytes // row_bytes))
    n8 = ((n + 7) // 8) * 8
    if n8 > 8:
        bn = min(bn, ((n8 // 2 + 7) // 8) * 8)   # keep >= 2 grid steps
    bn = min(bn, n8)
    return max(8, (bn // 8) * 8)


# ----------------------------------------------------------------------------
# Wrapper.  Weights are stored already transposed, i.e. (in, out): the kernel
# computes x @ w1.  Returns (outputs (N, H), weights (N, S, 1)) like the module.
# ----------------------------------------------------------------------------
def attention(x, w1, b1, w2, b2, *, block_n=None, compute_dtype=jnp.bfloat16):
    N, S, H = x.shape
    Hh = w1.shape[1]
    b1 = jnp.reshape(b1, (1, Hh)).astype(jnp.float32)
    w2 = jnp.reshape(w2, (1, Hh)).astype(jnp.float32)
    b2 = jnp.reshape(b2, (1, 1)).astype(jnp.float32)

    if block_n is None:
        block_n = _pick_block_n(N, S, H)
    assert block_n % 8 == 0, "block_n must be a multiple of 8 sublanes"

    Np = ((N + block_n - 1) // block_n) * block_n
    if Np != N:
        # TODO(synk): mask the ragged tail block in-kernel instead of padding;
        # jnp.pad re-copies x in HBM (extra traffic for a bandwidth-bound kernel).
        x = jnp.pad(x, ((0, Np - N), (0, 0), (0, 0)))

    kernel = functools.partial(attention_kernel, compute_dtype=compute_dtype)

    cost = pl.CostEstimate(
        flops=Np * S * (2 * H * Hh + 2 * Hh + 2 * H),
        transcendentals=Np * S,
        bytes_accessed=4 * (Np * S * H + H * Hh + 2 * Hh + 1 + Np * H + Np * S),
    )

    outs, wts = pl.pallas_call(
        kernel,
        grid=(Np // block_n,),
        in_specs=[
            pl.BlockSpec((block_n, S, H), lambda i: (i, 0, 0)),
            pl.BlockSpec((H, Hh), lambda i: (0, 0)),
            pl.BlockSpec((1, Hh), lambda i: (0, 0)),
            pl.BlockSpec((1, Hh), lambda i: (0, 0)),
            pl.BlockSpec((1, 1), lambda i: (0, 0)),
        ],
        out_specs=(
            pl.BlockSpec((block_n, H), lambda i: (i, 0)),
            pl.BlockSpec((block_n, S), lambda i: (i, 0)),
        ),
        out_shape=(jax.ShapeDtypeStruct((Np, H), jnp.float32),
                   jax.ShapeDtypeStruct((Np, S), jnp.float32)),
        compiler_params=pltpu.CompilerParams(
            dimension_semantics=("parallel",)),
        cost_estimate=cost,
    )(x, w1, b1, w2, b2)

    return outs[:N], wts[:N, :, None]


# ----------------------------------------------------------------------------
# Pure-JAX reference (mirrors the PyTorch module exactly).
# ----------------------------------------------------------------------------
def ref_attention(x, w1, b1, w2, b2):
    h = jax.nn.relu(jnp.einsum('nsh,hk->nsk', x, w1) + b1)        # (N, S, Hh)
    energy = jnp.einsum('nsk,k->ns', h, w2) + b2                  # (N, S)
    weights = jax.nn.softmax(energy, axis=1)[:, :, None]          # (N, S, 1)
    outputs = jnp.sum(x * weights, axis=1)                        # (N, H)
    return outputs, weights


if __name__ == "__main__":
    N, S, H = 16, 8, 32          # news items, sentences per item, hidden dim
    Hh = H // 2

    key = jax.random.PRNGKey(0)
    kx, k1, k2, k3, k4 = jax.random.split(key, 5)
    x = jax.random.normal(kx, (N, S, H), dtype=jnp.float32)
    w1 = (0.1 * jax.random.normal(k1, (H, Hh))).astype(jnp.float32)
    b1 = (0.1 * jax.random.normal(k2, (Hh,))).astype(jnp.float32)
    w2 = (0.1 * jax.random.normal(k3, (Hh,))).astype(jnp.float32)
    b2 = (0.1 * jax.random.normal(k4, ())).astype(jnp.float32)

    ref_out, ref_wts = ref_attention(x, w1, b1, w2, b2)

    # --- exact-math path (f32 MXU operands): tight tolerance ---
    out, wts = attention(x, w1, b1, w2, b2, compute_dtype=jnp.float32)
    jax.block_until_ready((out, wts))
    assert out.shape == (N, H) and wts.shape == (N, S, 1)
    assert jnp.allclose(out, ref_out, rtol=1e-3, atol=1e-3)
    assert jnp.allclose(wts, ref_wts, rtol=1e-3, atol=1e-3)

    # --- ragged batch (exercises the padding / tail path) ---
    out5, wts5 = attention(x[:5], w1, b1, w2, b2, compute_dtype=jnp.float32)
    jax.block_until_ready((out5, wts5))
    ref5_out, ref5_wts = ref_attention(x[:5], w1, b1, w2, b2)
    assert out5.shape == (5, H) and wts5.shape == (5, S, 1)
    assert jnp.allclose(out5, ref5_out, rtol=1e-3, atol=1e-3)
    assert jnp.allclose(wts5, ref5_wts, rtol=1e-3, atol=1e-3)

    # --- default perf path (bf16 MXU operands, f32 accumulation): loose check ---
    outb, wtsb = attention(x, w1, b1, w2, b2)
    jax.block_until_ready((outb, wtsb))
    assert jnp.allclose(outb, ref_out, rtol=5e-2, atol=5e-2)
    assert jnp.allclose(wtsb, ref_wts, rtol=5e-2, atol=2e-2)

    print("KERNEL_OK")
</pallas_src>

<mosaic_0001>
module attributes {stable_mosaic.version = 11 : i64} {
  func.func @attention_kernel(%arg0: i32, %arg1: memref<8x8x32xf32, #tpu.memory_space<vmem>>, %arg2: memref<32x16xf32, #tpu.memory_space<vmem>>, %arg3: memref<1x16xf32, #tpu.memory_space<vmem>>, %arg4: memref<1x16xf32, #tpu.memory_space<vmem>>, %arg5: memref<1x1xf32, #tpu.memory_space<vmem>>, %arg6: memref<8x32xf32, #tpu.memory_space<vmem>>, %arg7: memref<8x8xf32, #tpu.memory_space<vmem>>) attributes {dimension_semantics = [#tpu.dimension_semantics<parallel>], iteration_bounds = array<i64: 2>, scalar_prefetch = 0 : i64, scratch_operands = 0 : i64, tpu.core_type = #tpu.core_type<tc>, window_params = [{transform_indices = @transform_0, window_bounds = array<i64: 8, 8, 32>}, {pipeline_mode = #tpu.pipeline_mode<synchronous>, transform_indices = @transform_1, window_bounds = array<i64: 32, 16>}, {pipeline_mode = #tpu.pipeline_mode<synchronous>, transform_indices = @transform_2, window_bounds = array<i64: 1, 16>}, {pipeline_mode = #tpu.pipeline_mode<synchronous>, transform_indices = @transform_3, window_bounds = array<i64: 1, 16>}, {pipeline_mode = #tpu.pipeline_mode<synchronous>, transform_indices = @transform_4, window_bounds = array<i64: 1, 1>}, {transform_indices = @transform_5, window_bounds = array<i64: 8, 32>}, {transform_indices = @transform_6, window_bounds = array<i64: 8, 8>}]} {
    %c0 = arith.constant 0 : index
    %c0_0 = arith.constant 0 : index
    %c0_1 = arith.constant 0 : index
    %0 = vector.load %arg1[%c0, %c0_0, %c0_1] : memref<8x8x32xf32, #tpu.memory_space<vmem>>, vector<8x8x32xf32>
    %1 = vector.shape_cast %0 : vector<8x8x32xf32> to vector<64x32xf32>
    %c0_2 = arith.constant 0 : index
    %c0_3 = arith.constant 0 : index
    %2 = vector.load %arg2[%c0_2, %c0_3] : memref<32x16xf32, #tpu.memory_space<vmem>>, vector<32x16xf32>
    %cst = arith.constant dense<0.000000e+00> : vector<64x16xf32>
    %3 = tpu.matmul %1, %2, %cst {dimension_numbers = #tpu.dot_dimension_numbers<[1], [0], [0], [1], [0, 0, 1, 1], [], []>} : vector<64x32xf32>, vector<32x16xf32>, vector<64x16xf32> -> vector<64x16xf32>
    %c0_4 = arith.constant 0 : index
    %c0_5 = arith.constant 0 : index
    %4 = vector.load %arg3[%c0_4, %c0_5] : memref<1x16xf32, #tpu.memory_space<vmem>>, vector<1x16xf32>
    %5 = vector.broadcast %4 : vector<1x16xf32> to vector<64x16xf32>
    %6 = arith.addf %3, %5 : vector<64x16xf32>
    %cst_6 = arith.constant 0.000000e+00 : f32
    %7 = vector.broadcast %cst_6 : f32 to vector<64x16xf32>
    %8 = arith.maximumf %6, %7 : vector<64x16xf32>
    %9 = vector.shape_cast %8 : vector<64x16xf32> to vector<8x8x16xf32>
    %c0_7 = arith.constant 0 : index
    %c0_8 = arith.constant 0 : index
    %10 = vector.load %arg4[%c0_7, %c0_8] : memref<1x16xf32, #tpu.memory_space<vmem>>, vector<1x16xf32>
    %11 = vector.shape_cast %10 : vector<1x16xf32> to vector<1x1x16xf32>
    %12 = vector.broadcast %11 : vector<1x1x16xf32> to vector<8x8x16xf32>
    %13 = arith.mulf %9, %12 : vector<8x8x16xf32>
    %cst_9 = arith.constant dense<0.000000e+00> : vector<8x8xf32>
    %14 = vector.multi_reduction <add>, %13, %cst_9 [2] : vector<8x8x16xf32> to vector<8x8xf32>
    %c0_10 = arith.constant 0 : index
    %c0_11 = arith.constant 0 : index
    %15 = vector.load %arg5[%c0_10, %c0_11] : memref<1x1xf32, #tpu.memory_space<vmem>>, vector<1x1xf32>
    %16 = vector.broadcast %15 : vector<1x1xf32> to vector<8x8xf32>
    %17 = arith.addf %14, %16 : vector<8x8xf32>
    %cst_12 = arith.constant dense<0xFF800000> : vector<8xf32>
    %18 = vector.multi_reduction <maximumf>, %17, %cst_12 [1] : vector<8x8xf32> to vector<8xf32>
    %19 = vector.shape_cast %18 : vector<8xf32> to vector<8x1xf32>
    %20 = vector.broadcast %19 : vector<8x1xf32> to vector<8x8xf32>
    %21 = arith.subf %17, %20 : vector<8x8xf32>
    %22 = math.exp %21 : vector<8x8xf32>
    %cst_13 = arith.constant dense<0.000000e+00> : vector<8xf32>
    %23 = vector.multi_reduction <add>, %22, %cst_13 [1] : vector<8x8xf32> to vector<8xf32>
    %24 = vector.shape_cast %23 : vector<8xf32> to vector<8x1xf32>
    %25 = vector.broadcast %24 : vector<8x1xf32> to vector<8x8xf32>
    %26 = arith.divf %22, %25 : vector<8x8xf32>
    %c0_14 = arith.constant 0 : index
    %c0_15 = arith.constant 0 : index
    %27 = vector.load %arg7[%c0_14, %c0_15] : memref<8x8xf32, #tpu.memory_space<vmem>>, vector<8x8xf32>
    tpu.vector_store %arg7[%c0_14, %c0_15], %26 {strides = array<i32>} : memref<8x8xf32, #tpu.memory_space<vmem>>, vector<8x8xf32>,
    %c0_16 = arith.constant 0 : index
    %c0_17 = arith.constant 0 : index
    %c0_18 = arith.constant 0 : index
    %28 = vector.load %arg1[%c0_16, %c0_17, %c0_18] : memref<8x8x32xf32, #tpu.memory_space<vmem>>, vector<8x1x32xf32>
    %29 = vector.shape_cast %28 : vector<8x1x32xf32> to vector<8x32xf32>
    %30 = vector.extract_strided_slice %26 {offsets = [0, 0], sizes = [8, 1], strides = [1, 1]} : vector<8x8xf32> to vector<8x1xf32>
    %31 = vector.broadcast %30 : vector<8x1xf32> to vector<8x32xf32>
    %32 = arith.mulf %29, %31 : vector<8x32xf32>
    %c0_19 = arith.constant 0 : index
    %c1 = arith.constant 1 : index
    %c0_20 = arith.constant 0 : index
    %33 = vector.load %arg1[%c0_19, %c1, %c0_20] : memref<8x8x32xf32, #tpu.memory_space<vmem>>, vector<8x1x32xf32>
    %34 = vector.shape_cast %33 : vector<8x1x32xf32> to vector<8x32xf32>
    %35 = vector.extract_strided_slice %26 {offsets = [0, 1], sizes = [8, 1], strides = [1, 1]} : vector<8x8xf32> to vector<8x1xf32>
    %36 = vector.broadcast %35 : vector<8x1xf32> to vector<8x32xf32>
    %37 = arith.mulf %34, %36 : vector<8x32xf32>
    %38 = arith.addf %32, %37 : vector<8x32xf32>
    %c0_21 = arith.constant 0 : index
    %c2 = arith.constant 2 : index
    %c0_22 = arith.constant 0 : index
    %39 = vector.load %arg1[%c0_21, %c2, %c0_22] : memref<8x8x32xf32, #tpu.memory_space<vmem>>, vector<8x1x32xf32>
    %40 = vector.shape_cast %39 : vector<8x1x32xf32> to vector<8x32xf32>
    %41 = vector.extract_strided_slice %26 {offsets = [0, 2], sizes = [8, 1], strides = [1, 1]} : vector<8x8xf32> to vector<8x1xf32>
    %42 = vector.broadcast %41 : vector<8x1xf32> to vector<8x32xf32>
    %43 = arith.mulf %40, %42 : vector<8x32xf32>
    %44 = arith.addf %38, %43 : vector<8x32xf32>
    %c0_23 = arith.constant 0 : index
    %c3 = arith.constant 3 : index
    %c0_24 = arith.constant 0 : index
    %45 = vector.load %arg1[%c0_23, %c3, %c0_24] : memref<8x8x32xf32, #tpu.memory_space<vmem>>, vector<8x1x32xf32>
    %46 = vector.shape_cast %45 : vector<8x1x32xf32> to vector<8x32xf32>
    %47 = vector.extract_strided_slice %26 {offsets = [0, 3], sizes = [8, 1], strides = [1, 1]} : vector<8x8xf32> to vector<8x1xf32>
    %48 = vector.broadcast %47 : vector<8x1xf32> to vector<8x32xf32>
    %49 = arith.mulf %46, %48 : vector<8x32xf32>
    %50 = arith.addf %44, %49 : vector<8x32xf32>
    %c0_25 = arith.constant 0 : index
    %c4 = arith.constant 4 : index
    %c0_26 = arith.constant 0 : index
    %51 = vector.load %arg1[%c0_25, %c4, %c0_26] : memref<8x8x32xf32, #tpu.memory_space<vmem>>, vector<8x1x32xf32>
    %52 = vector.shape_cast %51 : vector<8x1x32xf32> to vector<8x32xf32>
    %53 = vector.extract_strided_slice %26 {offsets = [0, 4], sizes = [8, 1], strides = [1, 1]} : vector<8x8xf32> to vector<8x1xf32>
    %54 = vector.broadcast %53 : vector<8x1xf32> to vector<8x32xf32>
    %55 = arith.mulf %52, %54 : vector<8x32xf32>
    %56 = arith.addf %50, %55 : vector<8x32xf32>
    %c0_27 = arith.constant 0 : index
    %c5 = arith.constant 5 : index
    %c0_28 = arith.constant 0 : index
    %57 = vector.load %arg1[%c0_27, %c5, %c0_28] : memref<8x8x32xf32, #tpu.memory_space<vmem>>, vector<8x1x32xf32>
    %58 = vector.shape_cast %57 : vector<8x1x32xf32> to vector<8x32xf32>
    %59 = vector.extract_strided_slice %26 {offsets = [0, 5], sizes = [8, 1], strides = [1, 1]} : vector<8x8xf32> to vector<8x1xf32>
    %60 = vector.broadcast %59 : vector<8x1xf32> to vector<8x32xf32>
    %61 = arith.mulf %58, %60 : vector<8x32xf32>
    %62 = arith.addf %56, %61 : vector<8x32xf32>
    %c0_29 = arith.constant 0 : index
    %c6 = arith.constant 6 : index
    %c0_30 = arith.constant 0 : index
    %63 = vector.load %arg1[%c0_29, %c6, %c0_30] : memref<8x8x32xf32, #tpu.memory_space<vmem>>, vector<8x1x32xf32>
    %64 = vector.shape_cast %63 : vector<8x1x32xf32> to vector<8x32xf32>
    %65 = vector.extract_strided_slice %26 {offsets = [0, 6], sizes = [8, 1], strides = [1, 1]} : vector<8x8xf32> to vector<8x1xf32>
    %66 = vector.broadcast %65 : vector<8x1xf32> to vector<8x32xf32>
    %67 = arith.mulf %64, %66 : vector<8x32xf32>
    %68 = arith.addf %62, %67 : vector<8x32xf32>
    %c0_31 = arith.constant 0 : index
    %c7 = arith.constant 7 : index
    %c0_32 = arith.constant 0 : index
    %69 = vector.load %arg1[%c0_31, %c7, %c0_32] : memref<8x8x32xf32, #tpu.memory_space<vmem>>, vector<8x1x32xf32>
    %70 = vector.shape_cast %69 : vector<8x1x32xf32> to vector<8x32xf32>
    %71 = vector.extract_strided_slice %26 {offsets = [0, 7], sizes = [8, 1], strides = [1, 1]} : vector<8x8xf32> to vector<8x1xf32>
    %72 = vector.broadcast %71 : vector<8x1xf32> to vector<8x32xf32>
    %73 = arith.mulf %70, %72 : vector<8x32xf32>
    %74 = arith.addf %68, %73 : vector<8x32xf32>
    %c0_33 = arith.constant 0 : index
    %c0_34 = arith.constant 0 : index
    %75 = vector.load %arg6[%c0_33, %c0_34] : memref<8x32xf32, #tpu.memory_space<vmem>>, vector<8x32xf32>
    tpu.vector_store %arg6[%c0_33, %c0_34], %74 {strides = array<i32>} : memref<8x32xf32, #tpu.memory_space<vmem>>, vector<8x32xf32>,
    return
  }
  func.func @transform_0(%arg0: i32) -> (i32, i32, i32) {
    %c0_i32 = arith.constant 0 : i32
    %c0_i32_0 = arith.constant 0 : i32
    %c0_i32_1 = arith.constant 0 : i32
    return %arg0, %c0_i32, %c0_i32_0 : i32, i32, i32
  }
  func.func @transform_1(%arg0: i32) -> (i32, i32) {
    %c0_i32 = arith.constant 0 : i32
    %c0_i32_0 = arith.constant 0 : i32
    %c0_i32_1 = arith.constant 0 : i32
    return %c0_i32, %c0_i32_0 : i32, i32
  }
  func.func @transform_2(%arg0: i32) -> (i32, i32) {
    %c0_i32 = arith.constant 0 : i32
    %c0_i32_0 = arith.constant 0 : i32
    %c0_i32_1 = arith.constant 0 : i32
    return %c0_i32, %c0_i32_0 : i32, i32
  }
  func.func @transform_3(%arg0: i32) -> (i32, i32) {
    %c0_i32 = arith.constant 0 : i32
    %c0_i32_0 = arith.constant 0 : i32
    %c0_i32_1 = arith.constant 0 : i32
    return %c0_i32, %c0_i32_0 : i32, i32
  }
  func.func @transform_4(%arg0: i32) -> (i32, i32) {
    %c0_i32 = arith.constant 0 : i32
    %c0_i32_0 = arith.constant 0 : i32
    %c0_i32_1 = arith.constant 0 : i32
    return %c0_i32, %c0_i32_0 : i32, i32
  }
  func.func @transform_5(%arg0: i32) -> (i32, i32) {
    %c0_i32 = arith.constant 0 : i32
    %c0_i32_0 = arith.constant 0 : i32
    return %arg0, %c0_i32 : i32, i32
  }
  func.func @transform_6(%arg0: i32) -> (i32, i32) {
    %c0_i32 = arith.constant 0 : i32
    %c0_i32_0 = arith.constant 0 : i32
    return %arg0, %c0_i32 : i32, i32
  }
}

</mosaic_0001>

<bundles_post_ra>
// kernel: tpu_custom_call.1
= control target key start
LH: loop header
LB: loop body
LE: loop exit
PB: predicated region body
PF: predicated region fallthrough
CT: control target
= control target key end

     0   :  { %s2623_s0 = inlined_call_operand.hbm [shape: f32[16,8,32], index: 0, kind: input, shape index: {}]   ;;  %s2624_s1 = inlined_call_operand.vmem [shape: f32[32,16], index: 1, kind: input, shape index: {}]   ;;  %s2625_s2 = inlined_call_operand.vmem [shape: f32[1,16], index: 2, kind: input, shape index: {}]   ;;  %s2626_s3 = inlined_call_operand.vmem [shape: f32[1,16], index: 3, kind: input, shape index: {}]   ;;  %s2627_s4 = inlined_call_operand.<no memory space> [shape: f32[1,1], index: 4, kind: input, shape index: {}]   ;;  %s2628_s5 = inlined_call_operand.hbm [shape: f32[16,32], index: 5, kind: output, shape index: {0}]   ;;  %s2629_s6 = inlined_call_operand.vmem [shape: f32[16,8], index: 6, kind: output, shape index: {1}]  }
   0x1   :  { %v12_v0 = vstv %s2627_s4 }
   0x2   :  { %13 = vst [vmem:[#allocation2] sm:$0x1] %v12_v0 }
   0x3   :  { %14 = vsyncpa [#allocation4], 0 }
   0x4   :  { %16 = vsyncpa [#allocation4 + $0x1], 0 }
   0x5   :  { %17 = vsyncpa [#allocation5], 0 }
   0x6   :  { %19 = vsyncpa [#allocation5 + $0x1], 0  ;;  %s2015_s23 = smov 0   ;;  %s2017_s24 = smov 0  }
   0x7   :  { %s2019_s25 = smov 0   ;;  %s2021_s26 = smov 0  }
   0x8 LB: > { %s2036_s4 = sadd.s32 4294967295, %s1970_s26   ;;  %s1729_s27 = sadd.s32 4294967294, %s1970_s26   ;;  %s1970_s26 = sphi %s2021_s26, %s2644_s26   ;;  %s1966_s25 = sphi %s2019_s25, %s2643_s25   ;;  %s1962_s24 = sphi %s2017_s24, %s2642_s24   ;;  %s1958_s23 = sphi %s2015_s23, %s2641_s23  }
   0x9   : > { %s2040_s28 = sadd.s32 1, %s1970_s26   ;;  %s32_s29 = sadd.s32 1, %s1966_s25 }
   0xa   : > { %s29_s30 = ssub.s32 %s1970_s26, %s2040_s28  ;;  %p39_p0 = scmp.ne.s32.totalorder %s1966_s25, %s1962_s24 }
   0xb   : > { %p30_p1 = scmp.eq.s32.totalorder %s29_s30, 0  ;;  %p40_p2 = scmp.eq.s32.totalorder %s1970_s26, 0 }
   0xc   : > { %p45_p3 = scmp.ne.s32.totalorder %s1962_s24, %s1958_s23  ;;  %p46_p4 = scmp.eq.s32.totalorder %s2036_s4, 0 }
   0xd   : > { %s2052_s7 = scalar_select %p30_p1, %s1966_s25, %s32_s29  }
   0xe   : > { %p2054_p5 = por %p40_p2, %p39_p0  ;;  %p2058_p6 = por %p46_p4, %p45_p3 }
   0xf   : > { %p153_p7 = scmp.eq.s32.totalorder %s2036_s4, 1  ;;  %p159_p8 = scmp.eq.s32.totalorder %s1729_s27, 1 }
  0x10   : > { %s2633_s9 = scalar_select %p2058_p6, 1, 0 }
  0x11   : > { %p1807_p10 = scmp.lt.s32.totalorder %s1970_s26, 2  ;;  %p2065_p11 = por %p153_p7, %p39_p0 }
  0x12   : > { %p2069_p12 = por %p159_p8, %p45_p3  ;;  %s217_s12 = sand.u32 1, %s1966_s25  }
  0x13   : > { %s2634_s10 = scalar_select %p2065_p11, 1, 0 }
  0x14   : > { %s2635_s11 = scalar_select %p2069_p12, 1, 0 }
  0x15   : > { %s1754_s13 = sshll.u32 %s1970_s26, 10  ;;  %s1732_s14 = sshll.u32 %s217_s12, 6 }
  0x16   : > { %s2078_s17 = scalar_lea.hbm %s2623_s0, %s1754_s13  ;;  %s221_s18 = scalar_lea.vmem [#allocation3], %s1732_s14 }
  0x17   : > { %s228_s19 = sshll.u32 %s221_s18, 4  ;;  %p2082_p13 = pnand %p1807_p10, %p2054_p5  ;;  %s2086_s19 = int_to_ptr.vmem [resolvable:$true] %s228_s19 }
  0x18   : > { %s2088_s21 = scalar_lea.sflag [#allocation4], %s217_s12  ;;  %s1878_s22 = scalar_lea.hbm %s2078_s17, 1024 }
  0x19   : > { %p1879_p0 = scmp.ne.s32.totalorder %s2078_s17, %s1878_s22  ;;  %p1880_p1 = pneg %p2082_p13 }
  0x1a   : > { %s1883_s30 = scalar_lea.hbm %s2623_s0, 2048  ;;  %p1884_p4 = scmp.lt.s32.totalorder %s2078_s17, %s2623_s0 }
  0x1b   : > { %p1881_p2 = pnand %p1880_p1, %p1879_p0  ;;  %p1885_p5 = scmp.lt.s32.totalorder %s1883_s30, %s1878_s22 }
  0x1d   : > { %p1882_p3 = pneg %p1881_p2  ;;  %p1886_p7 = por %p1885_p5, %p1884_p4 }
  0x1f   : > { %p1887_p8 = pnand %p1886_p7, %p1882_p3 }
  0x21   : > { %1890 = shalt.err (!%p1887_p8)
}
  0x22   : > { %s1891_s12 = scalar_lea.vmem %s2086_s19, 1024  ;;  %s1972_s14 = smov [#allocation3]  }
  0x23   : > { %p1892_p10 = scmp.ne.s32.totalorder %s2086_s19, %s1891_s12  ;;  %s1896_s15 = sshll.u32 %s1972_s14, 4  ;;  %s1897_s15 = int_to_ptr.vmem [resolvable:$false] %s1896_s15 }
  0x24   : > { %s1898_s16 = scalar_lea.vmem %s1897_s15, 2048  ;;  %p1899_p2 = scmp.lt.s32.totalorder %s2086_s19, %s1897_s15 }
  0x25   : > { %p1894_p9 = pnand %p1892_p10, %p1880_p1  ;;  %p1900_p12 = scmp.lt.s32.totalorder %s1898_s16, %s1891_s12 }
  0x27   : > { %p1895_p0 = pneg %p1894_p9  ;;  %p1901_p11 = por %p1900_p12, %p1899_p2 }
  0x29   : > { %p1902_p6 = pnand %p1901_p11, %p1895_p0 }
  0x2b   : > { %1905 = shalt.err (!%p1902_p6)
}
  0x2c   : > { %s1973_s18 = smov 128   ;;  %s1974_s22 = smov 8  }
  0x2d   : > { %1802 = dma.hbm_to_vmem [thread:$0]  (!%p2082_p13), %s2078_s17, 1024, %s2086_s19, %s2088_s21, %s1973_s18, %s1973_s18, %s1974_s22  }
  0x2e   : > { %p1735_p9 = scmp.ge.s32.totalorder %s1970_s26, 1  ;;  %p236_p1 = scmp.lt.s32.totalorder %s1970_s26, 3 }
  0x30   : > { %p237_p3 = pnand %p1735_p9, %p236_p1 }
  0x31   : > { %s2112_s27 = sand.u32 (!%p237_p3), 1, %s1962_s24   ;;  %p2637_p6 = scmp.ne.s32.totalorder (!%p237_p3), %s2633_s9, 0 }
  0x32   : > { %240 = sbr.rel (%p237_p3) target bundleno = 1210 (0x4ba), region = 40  ;;  %s1736_s29 = sshll.u32 (!%p237_p3), %s2112_s27, 6 }
  0x33   : > { %s243_s30 = scalar_lea.sflag (!%p237_p3), [#allocation4], %s2112_s27  ;;  %s2116_s8 = scalar_lea.vmem (!%p237_p3), [#allocation3], %s1736_s29 }
  0x37   : > { %1949 = dma.done.wait (%p2637_p6), %s243_s30, 1024  }
  0x38   : > { %1951 = vsyncadd (%p2637_p6), %s243_s30, 4294966272  ;;  %v295_v1 = vld [vmem:[%s2624_s1 + $0x18] sm:$0xff]  ;;  %v294_v2 = vld [vmem:[%s2624_s1 + $0x10] sm:$0xff]  ;;  %vm303_vm0 = vcmask 261120   ;;  %v1975_v13 = vmov 0   ;;  %vm456_vm1 = vcmask 130048   ;;  %v507_v61 = vlaneseq }
  0x39   : > { %1767 = vmatprep.subr.mxu0 %v295_v1  ;;  %1787 = vmatprep.subr.mxu1 %v295_v1  ;;  %v293_v3 = vld [vmem:[%s2624_s1 + $0x8] sm:$0xff]  ;;  %v292_v5 = vld [vmem:[%s2624_s1] sm:$0xff]  ;;  %v286_v7 = vld [vmem:[%s2116_s8 + $0x10] sm:$0xff]  ;;  %vm541_vm2 = vcmask 1041409   ;;  %vm543_vm3 = vcmask 1042434   ;;  %vm545_vm4 = vcmask 1043459  }
  0x3a   : > { %1768 = vmatpush3.msra.mxu0 %v295_v1  ;;  %1791 = vmatpush3.msra.mxu1 %v295_v1  ;;  %v284_v4 = vld [vmem:[%s2116_s8] sm:$0xff]  ;;  %v285_v6 = vld [vmem:[%s2116_s8 + $0x8] sm:$0xff]  ;;  %v290_v10 = vld [vmem:[%s2116_s8 + $0x30] sm:$0xff]  ;;  %v508_v63 = vand.u32 127, %v507_v61  ;;  %v2164_v0 = vshrl.u32 %v507_v61, 7  ;;  %vm547_vm5 = vcmask 1044484  }
  0x3b   : > { %1769 = vmatprep.subr.mxu0 %v294_v2  ;;  %1788 = vmatprep.subr.mxu1 %v294_v2  ;;  %v288_v8 = vld [vmem:[%s2116_s8 + $0x20] sm:$0xff]  ;;  %v289_v9 = vld [vmem:[%s2116_s8 + $0x28] sm:$0xff]  ;;  %v287_v11 = vld [vmem:[%s2116_s8 + $0x18] sm:$0xff]  ;;  %vm549_vm6 = vcmask 1045509   ;;  %vm551_vm7 = vcmask 1046534   ;;  %vm553_vm8 = vcmask 1047559  }
  0x3c   : > { %1770 = vmatpush3.msra.mxu0 %v294_v2  ;;  %1792 = vmatpush3.msra.mxu1 %v294_v2  ;;  %v291_v12 = vld [vmem:[%s2116_s8 + $0x38] sm:$0xff]  ;;  %vm556_vm9 = vcmask 64512   ;;  %p280_p11 = scmp.lt.s32.totalorder %s2036_s4, 1  ;;  %s1737_s21 = sshll.u32 %s2112_s27, 3 }
  0x3d   : > { %1771 = vmatprep.subr.mxu0 %v293_v3  ;;  %1775 = vmatprep.mubr.msk.f32.mxu0 %vm303_vm0, %v284_v4  ;;  %v1739_v14 = vld [vmem:[%s2625_s2] ss:$0 sm:$0xff]  ;;  %s1751_s13 = sshll.u32 %s2036_s4, 7  ;;  %s272_s12 = scalar_lea.vmem [#allocation6], %s1737_s21 }
  0x3e   : > { %1772 = vmatpush3.msra.mxu0 %v293_v3  ;;  %1789 = vmatprep.subr.mxu1 %v293_v3  ;;  %v1748_v21 = vld [vmem:[%s2626_s3] ss:$0 sm:$0xff]  ;;  %s281_s29 = scalar_select %p280_p11, %s2036_s4, 1 }
  0x3f   : > { %1773 = vmatprep.subr.mxu0 %v292_v5  ;;  %1793 = vmatpush3.msra.mxu1 %v293_v3  ;;  %v1749_v56 = vld [vmem:[#allocation2] ss:$0 sm:$0xff]  ;;  %v2167_v3 = vsub.s32 %v508_v63, %v2164_v0  ;;  %s1632_s9 = sshll.u32 %s272_s12, 4  ;;  %s2584_s15 = scalar_lea.hbm %s2628_s5, %s1751_s13  ;;  %s1633_s9 = int_to_ptr.vmem [resolvable:$true] %s1632_s9 }
  0x40   : > { %1774 = vmatpush3.msra.mxu0 %v292_v5  ;;  %1790 = vmatprep.subr.mxu1 %v292_v5  ;;  %s1738_s30 = sshll.u32 %s281_s29, 3  ;;  %s1615_s16 = scalar_lea.sflag [#allocation5], %s2112_s27 }
  0x41   : > { %1776 = vmatmul.mubr.msk.f32.vlgmr.msra.gmra.mxu0 %vm303_vm0, %v285_v6  ;;  %1794 = vmatpush3.msra.mxu1 %v292_v5  ;;  %s283_s20 = scalar_lea.vmem %s2629_s6, %s1738_s30  ;;  %s1906_s18 = scalar_lea.vmem %s1633_s9, 128 }
  0x42   : > { %1778 = vmatprep.mubr.msk.f32.mxu0 %vm303_vm0, %v286_v7  ;;  %1781 = vmatprep.mubr.msk.f32.mxu1 %vm303_vm0, %v288_v8  ;;  %p1907_p12 = scmp.ne.s32.totalorder %s1633_s9, %s1906_s18  ;;  %p2638_p13 = scmp.ne.s32.totalorder %s2634_s10, 0 }
  0x43   : > { %1782 = vmatmul.mubr.msk.f32.vlgmr.msra.gmra.mxu1 %vm303_vm0, %v289_v9  ;;  %1844 = vset.pattern.permute.xlu0 %v1975_v13  ;;  %s1976_s4 = smov [#allocation6]  }
  0x44   : > { %1784 = vmatprep.mubr.msk.f32.mxu1 %vm303_vm0, %v290_v10  ;;  %1845 = vset.pattern.permute.xlu1 %v1975_v13  ;;  %p1908_p4 = pnand %p1907_p12, %p2638_p13  ;;  %s1910_s22 = sshll.u32 %s1976_s4, 4  ;;  %s1911_s22 = int_to_ptr.vmem [resolvable:$false] %s1910_s22 }
  0x45   : > { %1779 = vmatmul.mubr.msk.f32.gmra.mxu0 %vm303_vm0, %v287_v11  ;;  %s1912_s29 = scalar_lea.vmem %s1911_s22, 256  ;;  %p1913_p7 = scmp.lt.s32.totalorder %s1633_s9, %s1911_s22 }
  0x46   : > { %p1909_p5 = pneg %p1908_p4  ;;  %p1914_p8 = scmp.lt.s32.totalorder %s1912_s29, %s1906_s18 }
  0x47   : > { %1785 = vmatmul.mubr.msk.f32.gmra.mxu1 %vm303_vm0, %v291_v12 }
  0x48   : > { %p1915_p10 = por %p1914_p8, %p1913_p7 }
  0x4a   : > { %p1916_p0 = pnand %p1915_p10, %p1909_p5 }
 0x101   : > { %v1777_v15 = vpop.f32.mrf.mxu0 }
 0x102   : > { %v400_v16 = vadd.f32 %v1777_v15, %v1739_v14 }
 0x103   : > { %v394_v17 = vpop.f32.mrf.mxu0  ;;  %v1783_v18 = vpop.f32.mrf.mxu1 }
 0x104   : > { %v434_v19 = vmax.f32 %v400_v16, 0.0  ;;  %v395_v20 = vadd.f32 %v1739_v14, %v394_v17  ;;  %v420_v31 = vadd.f32 %v1783_v18, %v1739_v14 }
 0x105   : > { %v1780_v22 = vpop.f32.mrf.mxu0  ;;  %v414_v23 = vpop.f32.mrf.mxu1 }
 0x106   : > { %v433_v24 = vmax.f32 %v395_v20, 0.0  ;;  %v410_v25 = vadd.f32 %v1780_v22, %v1739_v14  ;;  %v415_v26 = vadd.f32 %v1739_v14, %v414_v23  ;;  %v449_v28 = vmul.f32 %v1748_v21, %v434_v19 }
 0x107   : > { %v1786_v27 = vpop.f32.mrf.mxu1  ;;  %v404_v29 = vpop.f32.mrf.mxu0  ;;  %v438_v40 = vmax.f32 %v420_v31, 0.0  ;;  %v2189_v31 = vsub.s32 1, %v2164_v0 }
 0x108   : > { %v436_v30 = vmax.f32 %v410_v25, 0.0  ;;  %v405_v32 = vadd.f32 %v1739_v14, %v404_v29  ;;  %v437_v33 = vmax.f32 %v415_v26, 0.0  ;;  %v460_v34 = vsel %vm456_vm1, %v449_v28, 0.0 }
 0x109   : > { %v424_v35 = vpop.f32.mrf.mxu1  ;;  %v448_v36 = vmul.f32 %v1748_v21, %v433_v24  ;;  %461 = vadd.xlane.f32.xlu0 %v460_v34  ;;  %v430_v41 = vadd.f32 %v1786_v27, %v1739_v14  ;;  %v453_v49 = vmul.f32 %v1748_v21, %v438_v40 }
 0x10a   : > { %v435_v37 = vmax.f32 %v405_v32, 0.0  ;;  %v425_v38 = vadd.f32 %v1739_v14, %v424_v35  ;;  %v451_v39 = vmul.f32 %v1748_v21, %v436_v30  ;;  %v452_v46 = vmul.f32 %v1748_v21, %v437_v33 }
 0x10b   : > { %v457_v45 = vsel %vm456_vm1, %v448_v36, 0.0  ;;  %v440_v48 = vmax.f32 %v430_v41, 0.0  ;;  %v472_v52 = vsel %vm456_vm1, %v453_v49, 0.0  ;;  %v2186_v30 = vsub.s32 0, %v2164_v0 }
 0x10c   : > { %v466_v42 = vsel %vm456_vm1, %v451_v39, 0.0  ;;  %v450_v43 = vmul.f32 %v1748_v21, %v435_v37  ;;  %v439_v44 = vmax.f32 %v425_v38, 0.0  ;;  %v469_v50 = vsel %vm456_vm1, %v452_v46, 0.0 }
 0x10d   : > { %467 = vadd.xlane.f32.xlu1 %v466_v42  ;;  %458 = vadd.xlane.f32.xlu0 %v457_v45  ;;  %v455_v53 = vmul.f32 %v1748_v21, %v440_v48  ;;  %v2192_v32 = vsub.s32 7, %v2164_v0  ;;  %v2195_v33 = vsub.s32 2, %v2164_v0  ;;  %v2201_v38 = vsub.s32 3, %v2164_v0 }
 0x10e   : > { %v463_v47 = vsel %vm456_vm1, %v450_v43, 0.0  ;;  %v454_v51 = vmul.f32 %v1748_v21, %v439_v44  ;;  %v2205_v43 = vsub.s32 4, %v2164_v0  ;;  %v2209_v48 = vsub.s32 5, %v2164_v0 }
 0x10f   : > { %v478_v55 = vsel %vm456_vm1, %v455_v53, 0.0  ;;  %v2213_v53 = vsub.s32 6, %v2164_v0 }
 0x110   : > { %v475_v54 = vsel %vm456_vm1, %v454_v51, 0.0 }
 0x111   : > { %464 = vadd.xlane.f32.xlu1 %v463_v47  ;;  %470 = vadd.xlane.f32.xlu0 %v469_v50 }
 0x115   : > { %473 = vadd.xlane.f32.xlu1 %v472_v52  ;;  %476 = vadd.xlane.f32.xlu0 %v475_v54 }
 0x119   : > { %479 = vadd.xlane.f32.xlu1 %v478_v55 }
 0x12b   : > { %488 = vperm.xlu0 %1844, %v1749_v56  }
 0x192   : > { %v462_v57 = vpop.xlane.xlu0 %461 }
 0x196   : > { %v459_v58 = vpop.xlane.xlu0 %458  ;;  %v468_v59 = vpop.xlane.xlu1 %467 }
 0x19a   : > { %v471_v60 = vpop.xlane.xlu0 %470  ;;  %v465_v62 = vpop.xlane.xlu1 %464 }
 0x19e   : > { %v477_v1 = vpop.xlane.xlu0 %476  ;;  %v474_v2 = vpop.xlane.xlu1 %473 }
 0x1a2   : > { %v480_v14 = vpop.xlane.xlu1 %479 }
 0x1a6   : > { %v489_v4 = vpop.permute.xlu0 %488 }
 0x1a7   : > { %v491_v5 = vadd.f32 %v489_v4, %v459_v58  ;;  %v492_v6 = vadd.f32 %v489_v4, %v462_v57  ;;  %v493_v7 = vadd.f32 %v489_v4, %v465_v62  ;;  %v494_v8 = vadd.f32 %v489_v4, %v468_v59 }
 0x1a8   : > { %v495_v9 = vadd.f32 %v489_v4, %v471_v60  ;;  %v496_v10 = vadd.f32 %v489_v4, %v474_v2  ;;  %v497_v15 = vadd.f32 %v489_v4, %v477_v1  ;;  %v498_v16 = vadd.f32 %v489_v4, %v480_v14 }
 0x1a9   : > { %v512_v11 = vrot.slane %v491_v5, %v2167_v3  ;;  %v516_v12 = vrot.slane %v492_v6, %v2167_v3  ;;  %v520_v13 = vrot.slane %v493_v7, %v2167_v3  ;;  %v524_v17 = vrot.slane %v494_v8, %v2167_v3 }
 0x1aa   : > { %v528_v19 = vrot.slane %v495_v9, %v2167_v3  ;;  %v532_v21 = vrot.slane %v496_v10, %v2167_v3  ;;  %v536_v23 = vrot.slane %v497_v15, %v2167_v3  ;;  %v540_v25 = vrot.slane %v498_v16, %v2167_v3 }
 0x1ab   : > { %v542_v18 = vsel %vm541_vm2, %v516_v12, %v512_v11 }
 0x1ac   : > { %v544_v20 = vsel %vm543_vm3, %v520_v13, %v542_v18 }
 0x1ad   : > { %v546_v22 = vsel %vm545_vm4, %v524_v17, %v544_v20 }
 0x1ae   : > { %v548_v24 = vsel %vm547_vm5, %v528_v19, %v546_v22 }
 0x1af   : > { %v550_v26 = vsel %vm549_vm6, %v532_v21, %v548_v24 }
 0x1b0   : > { %v552_v27 = vsel %vm551_vm7, %v536_v23, %v550_v26 }
 0x1b1   : > { %v554_v28 = vsel %vm553_vm8, %v540_v25, %v552_v27 }
 0x1b2   : > { %v557_v29 = vsel %vm556_vm9, %v554_v28, -inf }
 0x1b3   : > { %558 = vmax.xlane.f32.xlu1 %v557_v29 }
 0x23c   : > { %v559_v34 = vpop.xlane.xlu1 %558 }
 0x23d   : > { %v564_v35 = vrot.slane %v559_v34, %v2186_v30  ;;  %v568_v36 = vrot.slane %v559_v34, %v2189_v31  ;;  %v592_v37 = vrot.slane %v559_v34, %v2192_v32  ;;  %v572_v39 = vrot.slane %v559_v34, %v2195_v33 }
 0x23e   : > { %v576_v45 = vrot.slane %v559_v34, %v2201_v38  ;;  %v580_v50 = vrot.slane %v559_v34, %v2205_v43  ;;  %v584_v54 = vrot.slane %v559_v34, %v2209_v48  ;;  %v588_v57 = vrot.slane %v559_v34, %v2213_v53 }
 0x23f   : > { %v601_v40 = vsub.f32 %v491_v5, %v564_v35  ;;  %v602_v41 = vsub.f32 %v492_v6, %v568_v36  ;;  %v608_v44 = vsub.f32 %v498_v16, %v592_v37  ;;  %v603_v46 = vsub.f32 %v493_v7, %v572_v39 }
 0x240   : > { %v604_v51 = vsub.f32 %v494_v8, %v576_v45  ;;  %v605_v55 = vsub.f32 %v495_v9, %v580_v50  ;;  %v606_v58 = vsub.f32 %v496_v10, %v584_v54  ;;  %v607_v61 = vsub.f32 %v497_v15, %v588_v57 }
 0x241   : > { %v609_v42 = vmul.f32 1.442695, %v601_v40  ;;  %v611_v47 = vmul.f32 1.442695, %v602_v41  ;;  %v623_v49 = vmul.f32 1.442695, %v608_v44 }
 0x242   : > { %v613_v52 = vmul.f32 1.442695, %v603_v46  ;;  %v615_v56 = vmul.f32 1.442695, %v604_v51  ;;  %v617_v59 = vmul.f32 1.442695, %v605_v55 }
 0x243   : > { %1846 = vpow2.f32 %v609_v42  ;;  %v619_v62 = vmul.f32 1.442695, %v606_v58  ;;  %v621_v1 = vmul.f32 1.442695, %v607_v61 }
 0x244   : > { %1848 = vpow2.f32 %v611_v47 }
 0x245   : > { %1850 = vpow2.f32 %v623_v49 }
 0x246   : > { %1852 = vpow2.f32 %v613_v52 }
 0x247   : > { %1854 = vpow2.f32 %v615_v56 }
 0x248   : > { %1856 = vpow2.f32 %v617_v59 }
 0x249   : > { %1858 = vpow2.f32 %v619_v62 }
 0x24a   : > { %1860 = vpow2.f32 %v621_v1 }
 0x250   : > { %v1847_v60 = vpop.eup %1846 }
 0x251   : > { %634 = vperm.xlu1 %1845, %v1847_v60   ;;  %v1849_v63 = vpop.eup %1848 }
 0x252   : > { %v2217_v0 = vpop.eup %1850 }
 0x253   : > { %v2219_v2 = vpop.eup %1852  ;;  %655 = vperm.xlu0 %1844, %v2217_v0  }
 0x254   : > { %v2223_v4 = vpop.eup %1854 }
 0x255   : > { %637 = vperm.xlu1 %1845, %v1849_v63   ;;  %v2226_v5 = vpop.eup %1856 }
 0x256   : > { %v2229_v6 = vpop.eup %1858 }
 0x257   : > { %v1861_v7 = vpop.eup %1860 }
 0x259   : > { %640 = vperm.xlu1 %1845, %v2219_v2  }
 0x25d   : > { %643 = vperm.xlu1 %1845, %v2223_v4  }
 0x261   : > { %646 = vperm.xlu1 %1845, %v2226_v5  }
 0x265   : > { %649 = vperm.xlu1 %1845, %v2229_v6  }
 0x269   : > { %652 = vperm.xlu1 %1845, %v1861_v7  }
 0x2cc   : > { %v635_v8 = vpop.permute.xlu1 %634 }
 0x2cd   : > { %v660_v15 = vrot.slane %v635_v8, %v2167_v3 }
 0x2ce   : > { %v656_v21 = vpop.permute.xlu0 %655 }
 0x2cf   : > { %v688_v27 = vrot.slane %v656_v21, %v2167_v3 }
 0x2d0   : > { %v638_v9 = vpop.permute.xlu1 %637 }
 0x2d1   : > { %v664_v13 = vrot.slane %v638_v9, %v2167_v3 }
 0x2d3   : > { %v689_v19 = vsel %vm541_vm2, %v664_v13, %v660_v15 }
 0x2d4   : > { %v641_v10 = vpop.permute.xlu1 %640 }
 0x2d5   : > { %v668_v14 = vrot.slane %v641_v10, %v2167_v3 }
 0x2d7   : > { %v690_v22 = vsel %vm543_vm3, %v668_v14, %v689_v19 }
 0x2d8   : > { %v644_v11 = vpop.permute.xlu1 %643 }
 0x2d9   : > { %v672_v16 = vrot.slane %v644_v11, %v2167_v3 }
 0x2db   : > { %v691_v23 = vsel %vm545_vm4, %v672_v16, %v690_v22 }
 0x2dc   : > { %v647_v12 = vpop.permute.xlu1 %646 }
 0x2dd   : > { %v676_v18 = vrot.slane %v647_v12, %v2167_v3 }
 0x2df   : > { %v692_v25 = vsel %vm547_vm5, %v676_v18, %v691_v23 }
 0x2e0   : > { %v650_v17 = vpop.permute.xlu1 %649 }
 0x2e1   : > { %v680_v20 = vrot.slane %v650_v17, %v2167_v3 }
 0x2e3   : > { %v693_v28 = vsel %vm549_vm6, %v680_v20, %v692_v25 }
 0x2e4   : > { %v653_v24 = vpop.permute.xlu1 %652 }
 0x2e5   : > { %v684_v26 = vrot.slane %v653_v24, %v2167_v3 }
 0x2e7   : > { %v694_v29 = vsel %vm551_vm7, %v684_v26, %v693_v28 }
 0x2e8   : > { %v695_v34 = vsel %vm553_vm8, %v688_v27, %v694_v29 }
 0x2e9   : > { %v697_v35 = vsel %vm556_vm9, %v695_v34, 0.0 }
 0x2ea   : > { %698 = vadd.xlane.f32.xlu1 %v697_v35 }
 0x373   : > { %v699_v36 = vpop.xlane.xlu1 %698 }
 0x374   : > { %v704_v37 = vrot.slane %v699_v36, %v2186_v30  ;;  %v708_v39 = vrot.slane %v699_v36, %v2189_v31  ;;  %v712_v40 = vrot.slane %v699_v36, %v2195_v33  ;;  %v728_v41 = vrot.slane %v699_v36, %v2213_v53 }
 0x375   : > { %v716_v42 = vrot.slane %v699_v36, %v2201_v38  ;;  %v720_v44 = vrot.slane %v699_v36, %v2205_v43  ;;  %v724_v47 = vrot.slane %v699_v36, %v2209_v48  ;;  %v732_v56 = vrot.slane %v699_v36, %v2192_v32 }
 0x376   : > { %1862 = vrcp.f32 %v704_v37 }
 0x377   : > { %1864 = vrcp.f32 %v708_v39 }
 0x378   : > { %1866 = vrcp.f32 %v712_v40 }
 0x379   : > { %1868 = vrcp.f32 %v728_v41 }
 0x37a   : > { %1870 = vrcp.f32 %v716_v42 }
 0x37b   : > { %1872 = vrcp.f32 %v720_v44 }
 0x37c   : > { %1874 = vrcp.f32 %v724_v47 }
 0x37d   : > { %1876 = vrcp.f32 %v732_v56 }
 0x383   : > { %v1863_v45 = vpop.eup %1862 }
 0x384   : > { %v1865_v46 = vpop.eup %1864  ;;  %v2255_v49 = vmul.f32 %v1863_v45, %v1847_v60 }
 0x385   : > { %v2257_v50 = vmul.f32 %v1865_v46, %v1849_v63  ;;  %v1867_v52 = vpop.eup %1866 }
 0x386   : > { %766 = vperm.xlu0 %1844, %v2255_v49   ;;  %v1869_v54 = vpop.eup %1868  ;;  %v2267_v57 = vmul.f32 %v1867_v52, %v2219_v2  ;;  %v929_v61 = vrot.slane %v2255_v49, %v2189_v31  ;;  %v841_v11 = vrot.slane %v2255_v49, %v2186_v30  ;;  %v1121_v15 = vrot.slane %v2255_v49, %v2201_v38 }
 0x387   : > { %v845_v51 = vrot.slane %v2257_v50, %v2186_v30  ;;  %v2262_v55 = vmul.f32 %v1869_v54, %v1861_v7  ;;  %v1871_v59 = vpop.eup %1870  ;;  %v933_v22 = vrot.slane %v2257_v50, %v2189_v31  ;;  %v1217_v23 = vrot.slane %v2255_v49, %v2205_v43 }
 0x388   : > { %v2273_v60 = vmul.f32 %v1871_v59, %v2223_v4  ;;  %v1873_v62 = vpop.eup %1872  ;;  %v937_v1 = vrot.slane %v2267_v57, %v2189_v31  ;;  %v1033_v10 = vrot.slane %v2267_v57, %v2195_v33  ;;  %v1129_v17 = vrot.slane %v2267_v57, %v2201_v38 }
 0x389   : > { %882 = vperm.xlu1 %1845, %v845_v51   ;;  %v865_v58 = vrot.slane %v2262_v55, %v2186_v30  ;;  %v2279_v63 = vmul.f32 %v1873_v62, %v2226_v5  ;;  %v1875_v2 = vpop.eup %1874  ;;  %v953_v5 = vrot.slane %v2262_v55, %v2189_v31  ;;  %v1049_v13 = vrot.slane %v2262_v55, %v2195_v33 }
 0x38a   : > { %769 = vperm.xlu0 %1844, %v2257_v50   ;;  %v2285_v4 = vmul.f32 %v1875_v2, %v2229_v6  ;;  %v1877_v8 = vpop.eup %1876  ;;  %v1025_v6 = vrot.slane %v2255_v49, %v2195_v33  ;;  %v853_v14 = vrot.slane %v2273_v60, %v2186_v30  ;;  %v1145_v21 = vrot.slane %v2262_v55, %v2201_v38 }
 0x38b   : > { %v945_v7 = vrot.slane %v2279_v63, %v2189_v31  ;;  %v2294_v9 = vmul.f32 %v1877_v8, %v2217_v0  ;;  %v1041_v12 = vrot.slane %v2279_v63, %v2195_v33  ;;  %v849_v0 = vrot.slane %v2267_v57, %v2186_v30 }
 0x38c   : > { %v857_v16 = vrot.slane %v2279_v63, %v2186_v30  ;;  %v861_v18 = vrot.slane %v2285_v4, %v2186_v30  ;;  %v1137_v19 = vrot.slane %v2279_v63, %v2201_v38  ;;  %v941_v24 = vrot.slane %v2273_v60, %v2189_v31 }
 0x38d   : > { %897 = vperm.xlu1 %1845, %v865_v58   ;;  %v869_v20 = vrot.slane %v2294_v9, %v2186_v30  ;;  %v1225_v30 = vrot.slane %v2267_v57, %v2205_v43  ;;  %v949_v25 = vrot.slane %v2285_v4, %v2189_v31  ;;  %v1233_v26 = vrot.slane %v2279_v63, %v2205_v43 }
 0x38e   : > { %772 = vperm.xlu0 %1844, %v2267_v57   ;;  %v957_v27 = vrot.slane %v2294_v9, %v2189_v31  ;;  %v1241_v28 = vrot.slane %v2262_v55, %v2205_v43  ;;  %v1029_v29 = vrot.slane %v2257_v50, %v2195_v33  ;;  %v1313_v34 = vrot.slane %v2255_v49, %v2209_v48 }
 0x38f   : > { %v1037_v35 = vrot.slane %v2273_v60, %v2195_v33  ;;  %v1321_v31 = vrot.slane %v2267_v57, %v2209_v48  ;;  %v1045_v36 = vrot.slane %v2285_v4, %v2195_v33  ;;  %v1329_v37 = vrot.slane %v2279_v63, %v2209_v48 }
 0x390   : > { %v1053_v39 = vrot.slane %v2294_v9, %v2195_v33  ;;  %v1417_v40 = vrot.slane %v2267_v57, %v2213_v53  ;;  %v1125_v41 = vrot.slane %v2257_v50, %v2201_v38  ;;  %v1409_v42 = vrot.slane %v2255_v49, %v2213_v53 }
 0x391   : > { %967 = vperm.xlu1 %1845, %v929_v61   ;;  %v1133_v44 = vrot.slane %v2273_v60, %v2201_v38  ;;  %v1509_v33 = vrot.slane %v2257_v50, %v2192_v32  ;;  %v1141_v45 = vrot.slane %v2285_v4, %v2201_v38  ;;  %v1425_v46 = vrot.slane %v2279_v63, %v2213_v53 }
 0x392   : > { %775 = vperm.xlu0 %1844, %v2273_v60   ;;  %v1149_v47 = vrot.slane %v2294_v9, %v2201_v38  ;;  %v1341_v51 = vrot.slane %v2294_v9, %v2209_v48  ;;  %v1221_v52 = vrot.slane %v2257_v50, %v2205_v43  ;;  %v1505_v54 = vrot.slane %v2255_v49, %v2192_v32 }
 0x393   : > { %v1229_v56 = vrot.slane %v2273_v60, %v2205_v43  ;;  %v1433_v38 = vrot.slane %v2262_v55, %v2213_v53  ;;  %v1237_v58 = vrot.slane %v2285_v4, %v2205_v43  ;;  %v1437_v59 = vrot.slane %v2294_v9, %v2213_v53 }
 0x394   : > { %v1245_v61 = vrot.slane %v2294_v9, %v2205_v43  ;;  %v1529_v49 = vrot.slane %v2262_v55, %v2192_v32  ;;  %v1317_v62 = vrot.slane %v2257_v50, %v2209_v48  ;;  %v1413_v43 = vrot.slane %v2257_v50, %v2213_v53 }
 0x395   : > { %973 = vperm.xlu1 %1845, %v937_v1   ;;  %v1325_v1 = vrot.slane %v2273_v60, %v2209_v48  ;;  %v1333_v8 = vrot.slane %v2285_v4, %v2209_v48  ;;  %v1337_v50 = vrot.slane %v2262_v55, %v2209_v48 }
 0x396   : > { %778 = vperm.xlu0 %1844, %v2279_v63  }
 0x399   : > { %979 = vperm.xlu1 %1845, %v945_v7  }
 0x39a   : > { %781 = vperm.xlu0 %1844, %v2285_v4  }
 0x39d   : > { %985 = vperm.xlu1 %1845, %v953_v5  }
 0x39e   : > { %784 = vperm.xlu0 %1844, %v2262_v55  }
 0x3a1   : > { %1063 = vperm.xlu1 %1845, %v1025_v6  }
 0x3a2   : > { %787 = vperm.xlu0 %1844, %v2294_v9  }
 0x3a5   : > { %1069 = vperm.xlu1 %1845, %v1033_v10  }
 0x3a6   : > { %879 = vperm.xlu0 %1844, %v841_v11   ;;  %v1421_v11 = vrot.slane %v2273_v60, %v2213_v53 }
 0x3a9   : > { %1075 = vperm.xlu1 %1845, %v1041_v12  }
 0x3aa   : > { %885 = vperm.xlu0 %1844, %v849_v0  }
 0x3ad   : > { %1081 = vperm.xlu1 %1845, %v1049_v13  }
 0x3ae   : > { %888 = vperm.xlu0 %1844, %v853_v14  }
 0x3b1   : > { %1159 = vperm.xlu1 %1845, %v1121_v15   ;;  %v1513_v15 = vrot.slane %v2267_v57, %v2192_v32 }
 0x3b2   : > { %891 = vperm.xlu0 %1844, %v857_v16  }
 0x3b5   : > { %1165 = vperm.xlu1 %1845, %v1129_v17  }
 0x3b6   : > { %894 = vperm.xlu0 %1844, %v861_v18  }
 0x3b9   : > { %1171 = vperm.xlu1 %1845, %v1137_v19   ;;  %v836_v19 = vld [vmem:[%s2116_s8 + $0x30] sm:$0x1] }
 0x3ba   : > { %900 = vperm.xlu0 %1844, %v869_v20  }
 0x3bd   : > { %1177 = vperm.xlu1 %1845, %v1145_v21   ;;  %v924_v21 = vld [vmem:[%s2116_s8 + $0x31] sm:$0x1] }
 0x3be   : > { %970 = vperm.xlu0 %1844, %v933_v22   ;;  %v1429_v22 = vrot.slane %v2285_v4, %v2213_v53 }
 0x3c1   : > { %1255 = vperm.xlu1 %1845, %v1217_v23  }
 0x3c2   : > { %976 = vperm.xlu0 %1844, %v941_v24  }
 0x3c5   : > { %1261 = vperm.xlu1 %1845, %v1225_v30  }
 0x3c6   : > { %982 = vperm.xlu0 %1844, %v949_v25  }
 0x3c9   : > { %1267 = vperm.xlu1 %1845, %v1233_v26  }
 0x3ca   : > { %988 = vperm.xlu0 %1844, %v957_v27  }
 0x3cd   : > { %1273 = vperm.xlu1 %1845, %v1241_v28  }
 0x3ce   : > { %1066 = vperm.xlu0 %1844, %v1029_v29  }
 0x3d1   : > { %1351 = vperm.xlu1 %1845, %v1313_v34  }
 0x3d2   : > { %1072 = vperm.xlu0 %1844, %v1037_v35   ;;  %v1517_v35 = vrot.slane %v2273_v60, %v2192_v32  ;;  %v830_v60 = vld [vmem:[%s2116_s8] sm:$0x1] }
 0x3d5   : > { %1357 = vperm.xlu1 %1845, %v1321_v31  }
 0x3d6   : > { %1078 = vperm.xlu0 %1844, %v1045_v36  }
 0x3d9   : > { %1363 = vperm.xlu1 %1845, %v1329_v37  }
 0x3da   : > { %1084 = vperm.xlu0 %1844, %v1053_v39  }
 0x3dd   : > { %1453 = vperm.xlu1 %1845, %v1417_v40  }
 0x3de   : > { %1162 = vperm.xlu0 %1844, %v1125_v41   ;;  %v918_v41 = vld [vmem:[%s2116_s8 + $0x1] sm:$0x1] }
 0x3e1   : > { %1447 = vperm.xlu1 %1845, %v1409_v42  }
 0x3e2   : > { %1168 = vperm.xlu0 %1844, %v1133_v44  }
 0x3e5   : > { %1546 = vperm.xlu1 %1845, %v1509_v33   ;;  %v1521_v33 = vrot.slane %v2279_v63, %v2192_v32 }
 0x3e6   : > { %1174 = vperm.xlu0 %1844, %v1141_v45   ;;  %v1014_v45 = vld [vmem:[%s2116_s8 + $0x2] sm:$0x1] }
 0x3e9   : > { %1459 = vperm.xlu1 %1845, %v1425_v46  }
 0x3ea   : > { %1180 = vperm.xlu0 %1844, %v1149_v47  }
 0x3ed   : > { %1372 = vperm.xlu1 %1845, %v1341_v51  }
 0x3ee   : > { %1258 = vperm.xlu0 %1844, %v1221_v52  }
 0x3f1   : > { %1543 = vperm.xlu1 %1845, %v1505_v54   ;;  %v832_v54 = vld [vmem:[%s2116_s8 + $0x10] sm:$0x1] }
 0x3f2   : > { %1264 = vperm.xlu0 %1844, %v1229_v56  }
 0x3f5   : > { %1465 = vperm.xlu1 %1845, %v1433_v38  }
 0x3f6   : > { %1270 = vperm.xlu0 %1844, %v1237_v58   ;;  %v1525_v58 = vrot.slane %v2285_v4, %v2192_v32 }
 0x3f9   : > { %1468 = vperm.xlu1 %1845, %v1437_v59   ;;  %v1016_v59 = vld [vmem:[%s2116_s8 + $0x12] sm:$0x1] }
 0x3fa   : > { %1276 = vperm.xlu0 %1844, %v1245_v61  }
 0x3fd   : > { %1561 = vperm.xlu1 %1845, %v1529_v49  }
 0x3fe   : > { %1354 = vperm.xlu0 %1844, %v1317_v62  }
 0x401   : > { %v767_v2 = vpop.permute.xlu0 %766 }
 0x402   : > { %1360 = vperm.xlu0 %1844, %v1325_v1   ;;  %v792_v48 = vrot.slane %v767_v2, %v2167_v3  ;;  %v1020_v2 = vld [vmem:[%s2116_s8 + $0x32] sm:$0x1] }
 0x404   : > { %v2393_v7 = vpop.permute.xlu1 %882 }
 0x405   : > { %v770_v5 = vpop.permute.xlu0 %769 }
 0x406   : > { %1450 = vperm.xlu0 %1844, %v1413_v43   ;;  %v796_v18 = vrot.slane %v770_v5, %v2167_v3 }
 0x408   : > { %v898_v6 = vpop.permute.xlu1 %897  ;;  %v821_v30 = vsel %vm541_vm2, %v796_v18, %v792_v48 }
 0x409   : > { %v773_v10 = vpop.permute.xlu0 %772  ;;  %v916_v25 = vmul.f32 %v898_v6, %v836_v19 }
 0x40a   : > { %1366 = vperm.xlu0 %1844, %v1333_v8   ;;  %v800_v20 = vrot.slane %v773_v10, %v2167_v3  ;;  %v1533_v8 = vrot.slane %v2294_v9, %v2192_v32 }
 0x40c   : > { %v968_v12 = vpop.permute.xlu1 %967  ;;  %v822_v28 = vsel %vm543_vm3, %v800_v20, %v821_v30 }
 0x40d   : > { %v776_v0 = vpop.permute.xlu0 %775  ;;  %v998_v51 = vmul.f32 %v968_v12, %v918_v41  ;;  %v922_v12 = vld [vmem:[%s2116_s8 + $0x21] sm:$0x1] }
 0x40e   : > { %1456 = vperm.xlu0 %1844, %v1421_v11   ;;  %v804_v55 = vrot.slane %v776_v0, %v2167_v3  ;;  %v1110_v0 = vld [vmem:[%s2116_s8 + $0x3] sm:$0x1] }
 0x410   : > { %v974_v13 = vpop.permute.xlu1 %973  ;;  %v823_v53 = vsel %vm545_vm4, %v804_v55, %v822_v28  ;;  %v833_v28 = vld [vmem:[%s2116_s8 + $0x18] sm:$0x1] }
 0x411   : > { %v779_v14 = vpop.permute.xlu0 %778 }
 0x412   : > { %1369 = vperm.xlu0 %1844, %v1337_v50   ;;  %v808_v57 = vrot.slane %v779_v14, %v2167_v3  ;;  %v834_v50 = vld [vmem:[%s2116_s8 + $0x20] sm:$0x1]  ;;  %v1018_v14 = vld [vmem:[%s2116_s8 + $0x22] sm:$0x1] }
 0x414   : > { %v2406_v16 = vpop.permute.xlu1 %979  ;;  %v824_v31 = vsel %vm547_vm5, %v808_v57, %v823_v53 }
 0x415   : > { %v782_v17 = vpop.permute.xlu0 %781  ;;  %v1002_v18 = vmul.f32 %v2406_v16, %v922_v12  ;;  %v919_v16 = vld [vmem:[%s2116_s8 + $0x9] sm:$0x1] }
 0x416   : > { %1549 = vperm.xlu0 %1844, %v1513_v15   ;;  %v812_v26 = vrot.slane %v782_v17, %v2167_v3 }
 0x418   : > { %v986_v23 = vpop.permute.xlu1 %985  ;;  %v825_v39 = vsel %vm549_vm6, %v812_v26, %v824_v31 }
 0x419   : > { %v785_v24 = vpop.permute.xlu0 %784  ;;  %v1004_v27 = vmul.f32 %v986_v23, %v924_v21 }
 0x41a   : > { %1462 = vperm.xlu0 %1844, %v1429_v22   ;;  %v816_v29 = vrot.slane %v785_v24, %v2167_v3  ;;  %v831_v24 = vld [vmem:[%s2116_s8 + $0x8] sm:$0x1] }
 0x41b   : > { %v1012_v34 = vadd.f32 %v1004_v27, %v916_v25  ;;  %v911_v26 = vmul.f32 %v2393_v7, %v831_v24 }
 0x41c   : > { %v1064_v36 = vpop.permute.xlu1 %1063  ;;  %v826_v42 = vsel %vm551_vm7, %v816_v29, %v825_v39  ;;  %v921_v29 = vld [vmem:[%s2116_s8 + $0x19] sm:$0x1]  ;;  %v923_v39 = vld [vmem:[%s2116_s8 + $0x29] sm:$0x1] }
 0x41d   : > { %v788_v37 = vpop.permute.xlu0 %787  ;;  %v1094_v56 = vmul.f32 %v1064_v36, %v1014_v45 }
 0x41e   : > { %v820_v40 = vrot.slane %v788_v37, %v2167_v3  ;;  %1552 = vperm.xlu0 %1844, %v1517_v35   ;;  %v920_v3 = vld [vmem:[%s2116_s8 + $0x11] sm:$0x1]  ;;  %v835_v37 = vld [vmem:[%s2116_s8 + $0x28] sm:$0x1] }
 0x41f   : > { %v1000_v49 = vmul.f32 %v974_v13, %v920_v3  ;;  %v1015_v3 = vld [vmem:[%s2116_s8 + $0xa] sm:$0x1] }
 0x420   : > { %v827_v44 = vsel %vm553_vm8, %v820_v40, %v826_v42  ;;  %v1070_v46 = vpop.permute.xlu1 %1069 }
 0x421   : > { %829 = vst.msk [vmem:[%s283_s20] sm:$0xff] %vm556_vm9, %v827_v44  ;;  %v880_v47 = vpop.permute.xlu0 %879  ;;  %v1096_v43 = vmul.f32 %v1070_v46, %v1016_v59  ;;  %v837_v44 = vld [vmem:[%s2116_s8 + $0x38] sm:$0x1]  ;;  %v1017_v59 = vld [vmem:[%s2116_s8 + $0x1a] sm:$0x1] }
 0x422   : > { %v910_v52 = vmul.f32 %v880_v47, %v830_v60  ;;  %1555 = vperm.xlu0 %1844, %v1521_v33   ;;  %v925_v33 = vld [vmem:[%s2116_s8 + $0x39] sm:$0x1] }
 0x424   : > { %v1006_v38 = vadd.f32 %v998_v51, %v910_v52  ;;  %v1076_v61 = vpop.permute.xlu1 %1075 }
 0x425   : > { %v886_v63 = vpop.permute.xlu0 %885  ;;  %v1098_v9 = vmul.f32 %v1076_v61, %v1018_v14 }
 0x426   : > { %v912_v62 = vmul.f32 %v886_v63, %v832_v54  ;;  %1558 = vperm.xlu0 %1844, %v1525_v58   ;;  %v1102_v1 = vadd.f32 %v1094_v56, %v1006_v38 }
 0x428   : > { %v1008_v5 = vadd.f32 %v1000_v49, %v912_v62  ;;  %v1082_v6 = vpop.permute.xlu1 %1081  ;;  %v1019_v62 = vld [vmem:[%s2116_s8 + $0x2a] sm:$0x1] }
 0x429   : > { %v889_v10 = vpop.permute.xlu0 %888  ;;  %v1100_v4 = vmul.f32 %v1082_v6, %v1020_v2 }
 0x42a   : > { %1564 = vperm.xlu0 %1844, %v1533_v8   ;;  %v2447_v11 = vadd.f32 %v1096_v43, %v1008_v5  ;;  %v913_v31 = vmul.f32 %v889_v10, %v833_v28  ;;  %v1021_v8 = vld [vmem:[%s2116_s8 + $0x3a] sm:$0x1] }
 0x42b   : > { %v2452_v13 = vadd.f32 %v1100_v4, %v1012_v34 }
 0x42c   : > { %v1160_v15 = vpop.permute.xlu1 %1159 }
 0x42d   : > { %v892_v17 = vpop.permute.xlu0 %891  ;;  %v1190_v19 = vmul.f32 %v1160_v15, %v1110_v0 }
 0x42e   : > { %v914_v32 = vmul.f32 %v892_v17, %v834_v50 }
 0x42f   : > { %v2456_v20 = vadd.f32 %v1190_v19, %v1102_v1 }
 0x430   : > { %v1010_v21 = vadd.f32 %v1002_v18, %v914_v32  ;;  %v2458_v48 = vpop.permute.xlu1 %1165 }
 0x431   : > { %v895_v55 = vpop.permute.xlu0 %894 }
 0x432   : > { %v2460_v22 = vadd.f32 %v1098_v9, %v1010_v21  ;;  %v915_v60 = vmul.f32 %v895_v55, %v835_v37 }
 0x434   : > { %v2462_v57 = vpop.permute.xlu1 %1171 }
 0x435   : > { %v901_v23 = vpop.permute.xlu0 %900 }
 0x436   : > { %v917_v51 = vmul.f32 %v901_v23, %v837_v44 }
 0x438   : > { %v2466_v30 = vpop.permute.xlu1 %1177 }
 0x439   : > { %v971_v25 = vpop.permute.xlu0 %970 }
 0x43a   : > { %v999_v27 = vmul.f32 %v971_v25, %v919_v16  ;;  %v1111_v25 = vld [vmem:[%s2116_s8 + $0xb] sm:$0x1] }
 0x43c   : > { %v1007_v53 = vadd.f32 %v999_v27, %v911_v26  ;;  %v1256_v34 = vpop.permute.xlu1 %1255  ;;  %v1207_v26 = vld [vmem:[%s2116_s8 + $0xc] sm:$0x1] }
 0x43d   : > { %v977_v35 = vpop.permute.xlu0 %976 }
 0x43e   : > { %v1001_v36 = vmul.f32 %v977_v35, %v921_v29  ;;  %v1206_v29 = vld [vmem:[%s2116_s8 + $0x4] sm:$0x1]  ;;  %v1303_v35 = vld [vmem:[%s2116_s8 + $0xd] sm:$0x1] }
 0x440   : > { %v1009_v40 = vadd.f32 %v1001_v36, %v913_v31  ;;  %v2473_v41 = vpop.permute.xlu1 %1261  ;;  %v1302_v36 = vld [vmem:[%s2116_s8 + $0x5] sm:$0x1] }
 0x441   : > { %v983_v42 = vpop.permute.xlu0 %982 }
 0x442   : > { %v1003_v7 = vmul.f32 %v983_v42, %v923_v39  ;;  %v1286_v39 = vmul.f32 %v1256_v34, %v1206_v29 }
 0x444   : > { %v1011_v45 = vadd.f32 %v1003_v7, %v915_v60  ;;  %v2477_v46 = vpop.permute.xlu1 %1267  ;;  %v1398_v60 = vld [vmem:[%s2116_s8 + $0x6] sm:$0x1]  ;;  %v1399_v7 = vld [vmem:[%s2116_s8 + $0xe] sm:$0x1] }
 0x445   : > { %v989_v47 = vpop.permute.xlu0 %988 }
 0x446   : > { %v1005_v52 = vmul.f32 %v989_v47, %v925_v33  ;;  %v1494_v47 = vld [vmem:[%s2116_s8 + $0x7] sm:$0x1] }
 0x448   : > { %v1013_v54 = vadd.f32 %v1005_v52, %v917_v51  ;;  %v2480_v58 = vpop.permute.xlu1 %1273 }
 0x449   : > { %v1067_v56 = vpop.permute.xlu0 %1066 }
 0x44a   : > { %v1095_v38 = vmul.f32 %v1067_v56, %v1015_v3  ;;  %v1294_v3 = vadd.f32 %v1286_v39, %v2456_v20  ;;  %v1116_v39 = vld [vmem:[%s2116_s8 + $0x33] sm:$0x1] }
 0x44c   : > { %v1103_v61 = vadd.f32 %v1095_v38, %v1007_v53  ;;  %v1352_v2 = vpop.permute.xlu1 %1351 }
 0x44d   : > { %v1073_v63 = vpop.permute.xlu0 %1072  ;;  %v1382_v44 = vmul.f32 %v1352_v2, %v1302_v36  ;;  %v1496_v36 = vld [vmem:[%s2116_s8 + $0x17] sm:$0x1] }
 0x44e   : > { %v1097_v49 = vmul.f32 %v1073_v63, %v1017_v59 }
 0x44f   : > { %v1390_v59 = vadd.f32 %v1382_v44, %v1294_v3  ;;  %v1115_v3 = vld [vmem:[%s2116_s8 + $0x2b] sm:$0x1] }
 0x450   : > { %v2484_v1 = vadd.f32 %v1097_v49, %v1009_v40  ;;  %v1358_v12 = vpop.permute.xlu1 %1357  ;;  %v1112_v49 = vld [vmem:[%s2116_s8 + $0x13] sm:$0x1] }
 0x451   : > { %v1079_v43 = vpop.permute.xlu0 %1078  ;;  %v1192_v20 = vmul.f32 %v2458_v48, %v1112_v49  ;;  %v1211_v49 = vld [vmem:[%s2116_s8 + $0x2c] sm:$0x1] }
 0x452   : > { %v1099_v5 = vmul.f32 %v1079_v43, %v1019_v62 }
 0x454   : > { %v2487_v6 = vadd.f32 %v1099_v5, %v1011_v45  ;;  %v2491_v14 = vpop.permute.xlu1 %1363  ;;  %v1495_v45 = vld [vmem:[%s2116_s8 + $0xf] sm:$0x1]  ;;  %v1208_v5 = vld [vmem:[%s2116_s8 + $0x14] sm:$0x1] }
 0x455   : > { %v1085_v10 = vpop.permute.xlu0 %1084 }
 0x456   : > { %v1101_v4 = vmul.f32 %v1085_v10, %v1021_v8 }
 0x458   : > { %v2489_v0 = vadd.f32 %v1101_v4, %v1013_v54  ;;  %v1454_v18 = vpop.permute.xlu1 %1453  ;;  %v1304_v4 = vld [vmem:[%s2116_s8 + $0x15] sm:$0x1] }
 0x459   : > { %v1163_v50 = vpop.permute.xlu0 %1162 }
 0x45a   : > { %v1191_v28 = vmul.f32 %v1163_v50, %v1111_v25  ;;  %v1200_v25 = vadd.f32 %v1192_v20, %v2447_v11 }
 0x45c   : > { %v1448_v32 = vpop.permute.xlu1 %1447  ;;  %v1199_v40 = vadd.f32 %v1191_v28, %v1103_v61 }
 0x45d   : > { %v2493_v15 = vpop.permute.xlu0 %1168  ;;  %v1478_v54 = vmul.f32 %v1448_v32, %v1398_v60  ;;  %v1288_v32 = vmul.f32 %v2473_v41, %v1208_v5 }
 0x45f   : > { %v1486_v2 = vadd.f32 %v1478_v54, %v1390_v59  ;;  %v1296_v48 = vadd.f32 %v1288_v32, %v1200_v25  ;;  %v1117_v59 = vld [vmem:[%s2116_s8 + $0x3b] sm:$0x1]  ;;  %v1404_v25 = vld [vmem:[%s2116_s8 + $0x36] sm:$0x1] }
 0x460   : > { %v1547_v55 = vpop.permute.xlu1 %1546 }
 0x461   : > { %v2495_v17 = vpop.permute.xlu0 %1174  ;;  %v1575_v34 = vmul.f32 %v1547_v55, %v1495_v45  ;;  %v1400_v55 = vld [vmem:[%s2116_s8 + $0x16] sm:$0x1] }
 0x462   : > { %v1480_v29 = vmul.f32 %v1454_v18, %v1400_v55  ;;  %v1195_v5 = vmul.f32 %v2495_v17, %v1115_v3 }
 0x464   : > { %v2503_v24 = vpop.permute.xlu1 %1459 }
 0x465   : > { %v2497_v19 = vpop.permute.xlu0 %1180 }
 0x468   : > { %v2510_v53 = vpop.permute.xlu1 %1372 }
 0x469   : > { %v1259_v9 = vpop.permute.xlu0 %1258 }
 0x46a   : > { %v1287_v31 = vmul.f32 %v1259_v9, %v1207_v26  ;;  %v1384_v26 = vmul.f32 %v1358_v12, %v1304_v4  ;;  %v1210_v12 = vld [vmem:[%s2116_s8 + $0x24] sm:$0x1] }
 0x46c   : > { %v1295_v33 = vadd.f32 %v1287_v31, %v1199_v40  ;;  %v1544_v51 = vpop.permute.xlu1 %1543  ;;  %v1209_v31 = vld [vmem:[%s2116_s8 + $0x1c] sm:$0x1]  ;;  %v1392_v41 = vadd.f32 %v1384_v26, %v1296_v48  ;;  %v1203_v48 = vadd.f32 %v1195_v5, %v2487_v6 }
 0x46d   : > { %v2499_v21 = vpop.permute.xlu0 %1264  ;;  %v1574_v61 = vmul.f32 %v1544_v51, %v1494_v47  ;;  %v1196_v47 = vmul.f32 %v2466_v30, %v1116_v39  ;;  %v1401_v51 = vld [vmem:[%s2116_s8 + $0x1e] sm:$0x1]  ;;  %v1309_v39 = vld [vmem:[%s2116_s8 + $0x3d] sm:$0x1] }
 0x46e   : > { %v1488_v44 = vadd.f32 %v1480_v29, %v1392_v41  ;;  %v1289_v18 = vmul.f32 %v2499_v21, %v1209_v31 }
 0x46f   : > { %v1582_v8 = vadd.f32 %v1574_v61, %v1486_v2 }
 0x471   : > { %v2501_v23 = vpop.permute.xlu0 %1270 }
 0x472   : > { %v1291_v55 = vmul.f32 %v2501_v23, %v1211_v49 }
 0x475   : > { %v2505_v16 = vpop.permute.xlu0 %1276 }
 0x479   : > { %v1355_v27 = vpop.permute.xlu0 %1354 }
 0x47a   : > { %v1383_v42 = vmul.f32 %v1355_v27, %v1303_v35  ;;  %v1113_v27 = vld [vmem:[%s2116_s8 + $0x1b] sm:$0x1]  ;;  %v1114_v35 = vld [vmem:[%s2116_s8 + $0x23] sm:$0x1] }
 0x47b   : > { %v1193_v40 = vmul.f32 %v2493_v15, %v1113_v27  ;;  %v1194_v11 = vmul.f32 %v2462_v57, %v1114_v35  ;;  %v1308_v57 = vld [vmem:[%s2116_s8 + $0x35] sm:$0x1]  ;;  %v1498_v35 = vld [vmem:[%s2116_s8 + $0x27] sm:$0x1] }
 0x47c   : > { %v1391_v56 = vadd.f32 %v1383_v42, %v1295_v33  ;;  %v1305_v42 = vld [vmem:[%s2116_s8 + $0x1d] sm:$0x1]  ;;  %v1466_v33 = vpop.permute.xlu1 %1465 }
 0x47d   : > { %v1361_v37 = vpop.permute.xlu0 %1360  ;;  %v1201_v15 = vadd.f32 %v1193_v40, %v2484_v1  ;;  %v1202_v61 = vadd.f32 %v1194_v11, %v2460_v22  ;;  %v1484_v41 = vmul.f32 %v1466_v33, %v1404_v25 }
 0x47e   : > { %v1385_v54 = vmul.f32 %v1361_v37, %v1305_v42  ;;  %v1204_v37 = vadd.f32 %v1196_v47, %v2452_v13 }
 0x47f   : > { %v1297_v30 = vadd.f32 %v1289_v18, %v1201_v15  ;;  %v1499_v18 = vld [vmem:[%s2116_s8 + $0x2f] sm:$0x1] }
 0x481   : > { %v1451_v52 = vpop.permute.xlu0 %1450  ;;  %v1393_v22 = vadd.f32 %v1385_v54, %v1297_v30 }
 0x482   : > { %v1479_v38 = vmul.f32 %v1451_v52, %v1399_v7  ;;  %v1212_v7 = vld [vmem:[%s2116_s8 + $0x34] sm:$0x1]  ;;  %v1306_v52 = vld [vmem:[%s2116_s8 + $0x25] sm:$0x1] }
 0x483   : > { %v1292_v21 = vmul.f32 %v2480_v58, %v1212_v7  ;;  %v1497_v58 = vld [vmem:[%s2116_s8 + $0x1f] sm:$0x1] }
 0x484   : > { %v1487_v63 = vadd.f32 %v1479_v38, %v1391_v56  ;;  %v1290_v38 = vmul.f32 %v2477_v46, %v1210_v12  ;;  %v1213_v46 = vld [vmem:[%s2116_s8 + $0x3c] sm:$0x1] }
 0x485   : > { %v2520_v62 = vpop.permute.xlu0 %1366  ;;  %v1300_v32 = vadd.f32 %v1292_v21, %v1204_v37  ;;  %v1293_v26 = vmul.f32 %v2505_v16, %v1213_v46  ;;  %v1299_v16 = vadd.f32 %v1291_v55, %v1203_v48 }
 0x486   : > { %v1583_v43 = vadd.f32 %v1575_v34, %v1487_v63  ;;  %v1402_v63 = vld [vmem:[%s2116_s8 + $0x26] sm:$0x1] }
 0x487   : > { %v1482_v13 = vmul.f32 %v2503_v24, %v1402_v63 }
 0x488   : > { %v1598_v10 = vrot.slane %v1583_v43, 7  ;;  %v1386_v43 = vmul.f32 %v2491_v14, %v1306_v52  ;;  %v1307_v14 = vld [vmem:[%s2116_s8 + $0x2d] sm:$0x1] }
 0x489   : > { %v1457_v50 = vpop.permute.xlu0 %1456  ;;  %v1387_v23 = vmul.f32 %v2520_v62, %v1307_v14 }
 0x48a   : > { %v1599_v9 = vsel %vm541_vm2, %v1598_v10, %v1582_v8  ;;  %v1481_v2 = vmul.f32 %v1457_v50, %v1401_v51  ;;  %v1197_v8 = vmul.f32 %v2497_v19, %v1117_v59  ;;  %v1469_v10 = vpop.permute.xlu1 %1468  ;;  %v1298_v50 = vadd.f32 %v1290_v38, %v1202_v61  ;;  %v1405_v51 = vld [vmem:[%s2116_s8 + $0x3e] sm:$0x1]  ;;  %v1501_v38 = vld [vmem:[%s2116_s8 + $0x3f] sm:$0x1] }
 0x48b   : > { %v1395_v62 = vadd.f32 %v1387_v23, %v1299_v16  ;;  %v1485_v21 = vmul.f32 %v1469_v10, %v1405_v51 }
 0x48c   : > { %v1489_v27 = vadd.f32 %v1481_v2, %v1393_v22  ;;  %v1205_v24 = vadd.f32 %v1197_v8, %v2489_v0  ;;  %v1389_v0 = vmul.f32 %v2510_v53, %v1309_v39 }
 0x48d   : > { %v1370_v28 = vpop.permute.xlu0 %1369 }
 0x48e   : > { %v1388_v20 = vmul.f32 %v1370_v28, %v1308_v57  ;;  %v1394_v28 = vadd.f32 %v1386_v43, %v1298_v50  ;;  %v1301_v42 = vadd.f32 %v1293_v26, %v1205_v24  ;;  %v1562_v11 = vpop.permute.xlu1 %1561 }
 0x490   : > { %v1396_v29 = vadd.f32 %v1388_v20, %v1300_v32  ;;  %v1397_v15 = vadd.f32 %v1389_v0, %v1301_v42 }
 0x491   : > { %v1550_v60 = vpop.permute.xlu0 %1549 }
 0x492   : > { %v1576_v45 = vmul.f32 %v1550_v60, %v1496_v36  ;;  %v1490_v36 = vadd.f32 %v1482_v13, %v1394_v28  ;;  %v1500_v60 = vld [vmem:[%s2116_s8 + $0x37] sm:$0x1]  ;;  %v1493_v63 = vadd.f32 %v1485_v21, %v1397_v15 }
 0x493   : > { %v1580_v33 = vmul.f32 %v1562_v11, %v1500_v60 }
 0x494   : > { %v1584_v56 = vadd.f32 %v1576_v45, %v1488_v44  ;;  %v1492_v44 = vadd.f32 %v1484_v41, %v1396_v29 }
 0x495   : > { %v1463_v34 = vpop.permute.xlu0 %1462 }
 0x496   : > { %v1600_v1 = vrot.slane %v1584_v56, 6  ;;  %v1588_v56 = vadd.f32 %v1580_v33, %v1492_v44 }
 0x498   : > { %v1601_v4 = vsel %vm543_vm3, %v1600_v1, %v1599_v9  ;;  %v1403_v9 = vld [vmem:[%s2116_s8 + $0x2e] sm:$0x1]  ;;  %v1608_v49 = vrot.slane %v1588_v56, 2 }
 0x499   : > { %v1553_v17 = vpop.permute.xlu0 %1552  ;;  %v1483_v12 = vmul.f32 %v1463_v34, %v1403_v9 }
 0x49a   : > { %v1577_v19 = vmul.f32 %v1553_v17, %v1497_v58 }
 0x49b   : > { %v1491_v3 = vadd.f32 %v1483_v12, %v1395_v62 }
 0x49c   : > { %v1585_v31 = vadd.f32 %v1577_v19, %v1489_v27 }
 0x49d   : > { %v1556_v40 = vpop.permute.xlu0 %1555 }
 0x49e   : > { %v1602_v6 = vrot.slane %v1585_v31, 5  ;;  %v1578_v7 = vmul.f32 %v1556_v40, %v1498_v35 }
 0x4a0   : > { %v1603_v45 = vsel %vm545_vm4, %v1602_v6, %v1601_v4  ;;  %v1586_v47 = vadd.f32 %v1578_v7, %v1490_v36 }
 0x4a1   : > { %v1559_v52 = vpop.permute.xlu0 %1558 }
 0x4a2   : > { %v1604_v54 = vrot.slane %v1586_v47, 4  ;;  %v1579_v57 = vmul.f32 %v1559_v52, %v1499_v18 }
 0x4a4   : > { %v1605_v59 = vsel %vm547_vm5, %v1604_v54, %v1603_v45  ;;  %v1587_v34 = vadd.f32 %v1579_v57, %v1491_v3 }
 0x4a5   : > { %v1565_v53 = vpop.permute.xlu0 %1564 }
 0x4a6   : > { %v1606_v61 = vrot.slane %v1587_v34, 3  ;;  %v1581_v30 = vmul.f32 %v1565_v53, %v1501_v38 }
 0x4a8   : > { %v1607_v2 = vsel %vm549_vm6, %v1606_v61, %v1605_v59  ;;  %v1589_v1 = vadd.f32 %v1581_v30, %v1493_v63 }
 0x4a9   : > { %v1609_v37 = vsel %vm551_vm7, %v1608_v49, %v1607_v2 }
 0x4aa   : > { %v1610_v43 = vrot.slane %v1589_v1, 1 }
 0x4ac   : > { %v1611_v5 = vsel %vm553_vm8, %v1610_v43, %v1609_v37 }
 0x4ad   : > { %1613 = vst.msk [vmem:[%s272_s12] sm:$0xff] %vm303_vm0, %v1611_v5 }
 0x4ae   : > { %1919 = shalt.err (!%p1916_p0)
}
 0x4af   : > { %s1920_s30 = scalar_lea.hbm %s2584_s15, 128  ;;  %s1924_s19 = scalar_lea.hbm %s2628_s5, 256 }
 0x4b0   : > { %p1921_p2 = scmp.ne.s32.totalorder %s2584_s15, %s1920_s30  ;;  %p1925_p3 = scmp.lt.s32.totalorder %s2584_s15, %s2628_s5 }
 0x4b1   : > { %p1926_p6 = scmp.lt.s32.totalorder %s1924_s19, %s1920_s30 }
 0x4b2   : > { %p1922_p9 = pnand %p1921_p2, %p2638_p13 }
 0x4b3   : > { %p1927_p11 = por %p1926_p6, %p1925_p3 }
 0x4b4   : > { %p1923_p1 = pneg %p1922_p9 }
 0x4b6   : > { %p1928_p12 = pnand %p1927_p11, %p1923_p1 }
 0x4b8   : > { %1931 = shalt.err (!%p1928_p12)
}
 0x4b9   : > { %1797 = dma.vmem_to_hbm [thread:$0]  (%p2638_p13), %s1633_s9, 128, %s2584_s15, %s1615_s16  }
 0x4ba PF: > { %s1647_s13 = sand.u32 1, %s1958_s23   ;;  %p2639_p4 = scmp.ne.s32.totalorder %s2635_s11, 0 }
 0x4bb   : > { %p2640_p5 = scmp.ge.s32.totalorder %s1970_s26, 2  ;;  %s1648_s12 = scalar_lea.sflag [#allocation5], %s1647_s13 }
 0x4bd   : > { %p1804_p7 = pnand %p2640_p5, %p2639_p4 }
 0x4bf   : > { %p1805_p8 = pneg %p1804_p7 }
 0x4c1   : > { %1953 = dma.done.wait (%p1805_p8), %s1648_s12, 128  }
 0x4c2   : > { %1955 = vsyncadd (%p1805_p8), %s1648_s12, 4294967168  ;;  %p22_p10 = scmp.ge.s32.totalorder %s2040_s28, 4   ;;  %s2641_s23 = smov %s1962_s24 }
 0x4c3   : > { %s2642_s24 = smov %s1966_s25  ;;  %s2643_s25 = smov %s2052_s7 }
 0x4c4   : > { %s2644_s26 = smov %s2040_s28  ;;  %24 = sbr.rel (!%p22_p10) target bundleno = 8 (0x8), region = 97 }
 0x4c9   :  { %1660 = vsyncpa [#allocation4], 1 }
 0x4ca   :  { %1662 = vsyncpa [#allocation4 + $0x1], 1 }
 0x4cb   :  { %1663 = vsyncpa [#allocation5], 1 }
 0x4cc   :  { %1665 = vsyncpa [#allocation5 + $0x1], 1 }

</bundles_post_ra>
